<compile_context>
chip_gen: v6e
topology: v6e:2x2x1
jax: 0.10.0
libtpu: 0.0.40
codegen_flags: <defaults>
</compile_context>

<pallas_src>
import jax
import jax.numpy as jnp
import numpy as np
from jax.experimental import pallas as pl
from jax.experimental.pallas import tpu as pltpu

EPS = 1e-5  # nn.BatchNorm2d default eps


def _band_weights(w_oihw, width):
    """Fold the 3 kw taps + the W-dim zero padding of a 3x3/pad-1 conv into 3
    banded (W*Cin, W*Cout) block matrices (one per kh tap). Weight layout
    plumbing only — no flops moved out of the kernel."""
    cout, cin, n_kh, n_kw = w_oihw.shape
    hwio = jnp.transpose(w_oihw, (2, 3, 1, 0))              # (3, 3, Cin, Cout)
    a = jnp.zeros((n_kh, width * cin, width * cout), w_oihw.dtype)
    for kw in range(n_kw):
        for wo in range(width):
            wi = wo + kw - 1                                 # padding = 1
            if 0 <= wi < width:
                a = a.at[:, wi * cin:(wi + 1) * cin,
                         wo * cout:(wo + 1) * cout].set(hwio[:, kw])
    return a                                                 # (3, W*Cin, W*Cout)


def basic_block_forward(x_nchw, w1_oihw, w2_oihw, g1, b1, g2, b2,
                        mxu_dtype=jnp.bfloat16):
    """NCHW wrapper around the lane-dense NHWC-flattened Pallas kernel."""
    N, C, H, W = x_nchw.shape
    WC = W * C
    assert WC % 128 == 0, "lane-dense layout assumes W*C is a multiple of 128"
    assert (WC // C) & (WC // C - 1) == 0, "W must be a power of two for the lane-roll BN fold"
    NH = N * H
    inv_m = 1.0 / float(N * H * W)                           # 1 / (BN elements per channel)

    # NCHW -> lane-dense (N, H, W*C); pad H by one row each side (W padding is
    # folded into the banded weights). Cast once for the MXU operands.
    x = jnp.transpose(x_nchw, (0, 2, 3, 1)).reshape(N, H, WC)
    xp = jnp.pad(x, ((0, 0), (1, 1), (0, 0))).astype(mxu_dtype)

    a1 = _band_weights(w1_oihw, W).astype(mxu_dtype)         # (3, 128, 128)
    a2 = _band_weights(w2_oihw, W).astype(mxu_dtype)

    # BN affine params tiled along the lane axis (lane l = w*C + c -> gamma[c]).
    g1t = jnp.tile(g1.astype(jnp.float32), W).reshape(1, WC)
    b1t = jnp.tile(b1.astype(jnp.float32), W).reshape(1, WC)
    g2t = jnp.tile(g2.astype(jnp.float32), W).reshape(1, WC)
    b2t = jnp.tile(b2.astype(jnp.float32), W).reshape(1, WC)

    def kernel(xp_ref, a1_ref, a2_ref, g1_ref, b1_ref, g2_ref, b2_ref,
               o_ref, pad_ref):

        def bn_scale_shift(acc, gamma, beta):
            # One-pass train-mode batch stats: var = E[x^2] - mean^2.
            # Reduce over rows first (one cross-sublane reduce -> (1, WC)),
            # then fold the W lane positions per channel with log2(W) circular
            # lane rolls on a single vreg (XLU slot, idle here). Each lane ends
            # up holding the per-channel sum already broadcast to the (1, 128)
            # layout the scale/shift need.
            def fold(v):
                v = jnp.sum(v, axis=0, keepdims=True)        # (1, WC)
                shift = C
                while shift < WC:
                    v = v + pltpu.roll(v, shift=shift, axis=1)
                    shift *= 2
                return v

            s1 = fold(acc)
            s2 = fold(acc * acc)
            mean = s1 * inv_m
            var = s2 * inv_m - mean * mean
            scale = gamma * jax.lax.rsqrt(var + EPS)         # EUP rsqrt
            return scale, beta - mean * scale

        def conv3x3(src_ref, a_ref):
            # 3 banded matmuls, one per kh tap; the kw taps and the W-dim zero
            # padding live inside a_ref. bf16 (or f32) operands, f32 accumulate.
            # Also return the center tap (the un-padded activation rows) so the
            # caller can reuse it (identity shortcut) without a second load.
            taps = [src_ref[:, kh:kh + H, :].reshape(NH, WC) for kh in range(3)]
            acc = jnp.zeros((NH, WC), jnp.float32)
            for kh in range(3):
                acc += jnp.dot(taps[kh], a_ref[kh],
                               preferred_element_type=jnp.float32)
            return acc, taps[1]

        # ---- conv1 + bn1 + relu --------------------------------------------
        acc1, x_center = conv3x3(xp_ref, a1_ref)
        sc1, sh1 = bn_scale_shift(acc1, g1_ref[...], b1_ref[...])
        out1 = jnp.maximum(acc1 * sc1 + sh1, 0.0)

        # ---- h-pad the intermediate for conv2: zero ONLY the 2 halo rows ----
        pad_ref[:, 1:1 + H, :] = out1.reshape(N, H, WC).astype(pad_ref.dtype)
        halo = jnp.zeros((N, 1, WC), pad_ref.dtype)
        pad_ref[:, 0:1, :] = halo
        pad_ref[:, H + 1:H + 2, :] = halo

        # ---- conv2 + bn2 + identity shortcut + relu -------------------------
        acc2, _ = conv3x3(pad_ref, a2_ref)
        sc2, sh2 = bn_scale_shift(acc2, g2_ref[...], b2_ref[...])
        shortcut = x_center.astype(jnp.float32)              # reuse conv1 center tap
        out = jnp.maximum(acc2 * sc2 + sh2 + shortcut, 0.0)
        o_ref[...] = out.astype(o_ref.dtype)                 # 128-lane dense store

    vmem = pl.BlockSpec(memory_space=pltpu.MemorySpace.VMEM)
    out_flat = pl.pallas_call(
        kernel,
        out_shape=jax.ShapeDtypeStruct((NH, WC), x_nchw.dtype),
        in_specs=[vmem] * 7,
        out_specs=vmem,
        scratch_shapes=[pltpu.VMEM((N, H + 2, WC), mxu_dtype)],
    )(xp, a1, a2, g1t, b1t, g2t, b2t)

    return jnp.transpose(out_flat.reshape(N, H, W, C), (0, 3, 1, 2))   # -> NCHW


def reference_forward(x, w1, w2, g1, b1, g2, b2):
    """Plain-JAX reference mirroring the PyTorch forward (NCHW, train-mode BN)."""
    def conv(a, w):
        return jax.lax.conv_general_dilated(
            a, w, (1, 1), ((1, 1), (1, 1)),
            dimension_numbers=("NCHW", "OIHW", "NCHW"))

    def bn(a, g, b):
        mean = jnp.mean(a, axis=(0, 2, 3), keepdims=True)
        var = jnp.mean((a - mean) ** 2, axis=(0, 2, 3), keepdims=True)
        return ((a - mean) * jax.lax.rsqrt(var + EPS)
                * g.reshape(1, -1, 1, 1) + b.reshape(1, -1, 1, 1))

    out = jax.nn.relu(bn(conv(x, w1), g1, b1))
    out = bn(conv(out, w2), g2, b2)
    return jax.nn.relu(out + x)


if __name__ == "__main__":
    key = jax.random.PRNGKey(0)
    k1, k2, k3, k4, k5, k6, k7 = jax.random.split(key, 7)

    N, C, H, W = 2, 8, 16, 16          # in_planes == planes == 8, stride == 1, W*C == 128
    x = jax.random.normal(k1, (N, C, H, W), jnp.float32)
    w1 = jax.random.normal(k2, (C, C, 3, 3), jnp.float32) * 0.1   # conv1.weight (OIHW)
    w2 = jax.random.normal(k3, (C, C, 3, 3), jnp.float32) * 0.1   # conv2.weight (OIHW)
    g1 = 1.0 + 0.1 * jax.random.normal(k4, (C,), jnp.float32)     # bn1.weight
    b1 = 0.1 * jax.random.normal(k5, (C,), jnp.float32)           # bn1.bias
    g2 = 1.0 + 0.1 * jax.random.normal(k6, (C,), jnp.float32)     # bn2.weight
    b2 = 0.1 * jax.random.normal(k7, (C,), jnp.float32)           # bn2.bias

    ref = jax.block_until_ready(reference_forward(x, w1, w2, g1, b1, g2, b2))

    # f32 MXU operands: the algorithm / banded-weight layout must match tightly.
    out_f32 = jax.block_until_ready(
        basic_block_forward(x, w1, w2, g1, b1, g2, b2, mxu_dtype=jnp.float32))
    np.testing.assert_allclose(np.asarray(out_f32), np.asarray(ref),
                               rtol=1e-4, atol=1e-4)

    # bf16 MXU operands + f32 accumulate (fast MXU path on v5e/v6e/v7x); looser
    # tolerance only accounts for bf16 operand rounding vs the f32 reference.
    out_bf16 = jax.block_until_ready(
        basic_block_forward(x, w1, w2, g1, b1, g2, b2, mxu_dtype=jnp.bfloat16))
    np.testing.assert_allclose(np.asarray(out_bf16), np.asarray(ref),
                               rtol=3e-2, atol=3e-2)

    print("KERNEL_OK")
</pallas_src>

<mosaic_0001>
module attributes {stable_mosaic.version = 11 : i64} {
  func.func @kernel(%arg0: memref<2x18x128xf32, #tpu.memory_space<vmem>>, %arg1: memref<3x128x128xf32, #tpu.memory_space<vmem>>, %arg2: memref<3x128x128xf32, #tpu.memory_space<vmem>>, %arg3: memref<1x128xf32, #tpu.memory_space<vmem>>, %arg4: memref<1x128xf32, #tpu.memory_space<vmem>>, %arg5: memref<1x128xf32, #tpu.memory_space<vmem>>, %arg6: memref<1x128xf32, #tpu.memory_space<vmem>>, %arg7: memref<32x128xf32, #tpu.memory_space<vmem>>, %arg8: memref<2x18x128xf32, #tpu.memory_space<vmem>>) attributes {dimension_semantics = [], scalar_prefetch = 0 : i64, scratch_operands = 1 : i64, tpu.core_type = #tpu.core_type<tc>} {
    %c0 = arith.constant 0 : index
    %c0_0 = arith.constant 0 : index
    %c0_1 = arith.constant 0 : index
    %0 = vector.load %arg0[%c0, %c0_0, %c0_1] : memref<2x18x128xf32, #tpu.memory_space<vmem>>, vector<2x16x128xf32>
    %1 = vector.shape_cast %0 : vector<2x16x128xf32> to vector<32x128xf32>
    %c0_2 = arith.constant 0 : index
    %c1 = arith.constant 1 : index
    %c0_3 = arith.constant 0 : index
    %2 = vector.load %arg0[%c0_2, %c1, %c0_3] : memref<2x18x128xf32, #tpu.memory_space<vmem>>, vector<2x16x128xf32>
    %3 = vector.shape_cast %2 : vector<2x16x128xf32> to vector<32x128xf32>
    %c0_4 = arith.constant 0 : index
    %c2 = arith.constant 2 : index
    %c0_5 = arith.constant 0 : index
    %4 = vector.load %arg0[%c0_4, %c2, %c0_5] : memref<2x18x128xf32, #tpu.memory_space<vmem>>, vector<2x16x128xf32>
    %5 = vector.shape_cast %4 : vector<2x16x128xf32> to vector<32x128xf32>
    %cst = arith.constant 0.000000e+00 : f32
    %6 = vector.broadcast %cst : f32 to vector<32x128xf32>
    %c0_6 = arith.constant 0 : index
    %c0_7 = arith.constant 0 : index
    %c0_8 = arith.constant 0 : index
    %7 = vector.load %arg1[%c0_6, %c0_7, %c0_8] : memref<3x128x128xf32, #tpu.memory_space<vmem>>, vector<1x128x128xf32>
    %8 = vector.shape_cast %7 : vector<1x128x128xf32> to vector<128x128xf32>
    %cst_9 = arith.constant dense<0.000000e+00> : vector<32x128xf32>
    %9 = tpu.matmul %1, %8, %cst_9 {dimension_numbers = #tpu.dot_dimension_numbers<[1], [0], [0], [1], [0, 0, 1, 1], [], []>} : vector<32x128xf32>, vector<128x128xf32>, vector<32x128xf32> -> vector<32x128xf32>
    %10 = arith.addf %6, %9 : vector<32x128xf32>
    %c1_10 = arith.constant 1 : index
    %c0_11 = arith.constant 0 : index
    %c0_12 = arith.constant 0 : index
    %11 = vector.load %arg1[%c1_10, %c0_11, %c0_12] : memref<3x128x128xf32, #tpu.memory_space<vmem>>, vector<1x128x128xf32>
    %12 = vector.shape_cast %11 : vector<1x128x128xf32> to vector<128x128xf32>
    %cst_13 = arith.constant dense<0.000000e+00> : vector<32x128xf32>
    %13 = tpu.matmul %3, %12, %cst_13 {dimension_numbers = #tpu.dot_dimension_numbers<[1], [0], [0], [1], [0, 0, 1, 1], [], []>} : vector<32x128xf32>, vector<128x128xf32>, vector<32x128xf32> -> vector<32x128xf32>
    %14 = arith.addf %10, %13 : vector<32x128xf32>
    %c2_14 = arith.constant 2 : index
    %c0_15 = arith.constant 0 : index
    %c0_16 = arith.constant 0 : index
    %15 = vector.load %arg1[%c2_14, %c0_15, %c0_16] : memref<3x128x128xf32, #tpu.memory_space<vmem>>, vector<1x128x128xf32>
    %16 = vector.shape_cast %15 : vector<1x128x128xf32> to vector<128x128xf32>
    %cst_17 = arith.constant dense<0.000000e+00> : vector<32x128xf32>
    %17 = tpu.matmul %5, %16, %cst_17 {dimension_numbers = #tpu.dot_dimension_numbers<[1], [0], [0], [1], [0, 0, 1, 1], [], []>} : vector<32x128xf32>, vector<128x128xf32>, vector<32x128xf32> -> vector<32x128xf32>
    %18 = arith.addf %14, %17 : vector<32x128xf32>
    %c0_18 = arith.constant 0 : index
    %c0_19 = arith.constant 0 : index
    %19 = vector.load %arg3[%c0_18, %c0_19] : memref<1x128xf32, #tpu.memory_space<vmem>>, vector<1x128xf32>
    %c0_20 = arith.constant 0 : index
    %c0_21 = arith.constant 0 : index
    %20 = vector.load %arg4[%c0_20, %c0_21] : memref<1x128xf32, #tpu.memory_space<vmem>>, vector<1x128xf32>
    %cst_22 = arith.constant dense<0.000000e+00> : vector<128xf32>
    %21 = vector.multi_reduction <add>, %18, %cst_22 [0] : vector<32x128xf32> to vector<128xf32>
    %22 = vector.shape_cast %21 : vector<128xf32> to vector<1x128xf32>
    %c8_i32 = arith.constant 8 : i32
    %23 = tpu.dynamic_rotate %22 by %c8_i32 dim 1 : vector<1x128xf32>, i32 -> vector<1x128xf32>
    %24 = arith.addf %22, %23 : vector<1x128xf32>
    %c16_i32 = arith.constant 16 : i32
    %25 = tpu.dynamic_rotate %24 by %c16_i32 dim 1 : vector<1x128xf32>, i32 -> vector<1x128xf32>
    %26 = arith.addf %24, %25 : vector<1x128xf32>
    %c32_i32 = arith.constant 32 : i32
    %27 = tpu.dynamic_rotate %26 by %c32_i32 dim 1 : vector<1x128xf32>, i32 -> vector<1x128xf32>
    %28 = arith.addf %26, %27 : vector<1x128xf32>
    %c64_i32 = arith.constant 64 : i32
    %29 = tpu.dynamic_rotate %28 by %c64_i32 dim 1 : vector<1x128xf32>, i32 -> vector<1x128xf32>
    %30 = arith.addf %28, %29 : vector<1x128xf32>
    %31 = arith.mulf %18, %18 : vector<32x128xf32>
    %cst_23 = arith.constant dense<0.000000e+00> : vector<128xf32>
    %32 = vector.multi_reduction <add>, %31, %cst_23 [0] : vector<32x128xf32> to vector<128xf32>
    %33 = vector.shape_cast %32 : vector<128xf32> to vector<1x128xf32>
    %c8_i32_24 = arith.constant 8 : i32
    %34 = tpu.dynamic_rotate %33 by %c8_i32_24 dim 1 : vector<1x128xf32>, i32 -> vector<1x128xf32>
    %35 = arith.addf %33, %34 : vector<1x128xf32>
    %c16_i32_25 = arith.constant 16 : i32
    %36 = tpu.dynamic_rotate %35 by %c16_i32_25 dim 1 : vector<1x128xf32>, i32 -> vector<1x128xf32>
    %37 = arith.addf %35, %36 : vector<1x128xf32>
    %c32_i32_26 = arith.constant 32 : i32
    %38 = tpu.dynamic_rotate %37 by %c32_i32_26 dim 1 : vector<1x128xf32>, i32 -> vector<1x128xf32>
    %39 = arith.addf %37, %38 : vector<1x128xf32>
    %c64_i32_27 = arith.constant 64 : i32
    %40 = tpu.dynamic_rotate %39 by %c64_i32_27 dim 1 : vector<1x128xf32>, i32 -> vector<1x128xf32>
    %41 = arith.addf %39, %40 : vector<1x128xf32>
    %cst_28 = arith.constant 0.001953125 : f32
    %42 = vector.broadcast %cst_28 : f32 to vector<1x128xf32>
    %43 = arith.mulf %30, %42 : vector<1x128xf32>
    %cst_29 = arith.constant 0.001953125 : f32
    %44 = vector.broadcast %cst_29 : f32 to vector<1x128xf32>
    %45 = arith.mulf %41, %44 : vector<1x128xf32>
    %46 = arith.mulf %43, %43 : vector<1x128xf32>
    %47 = arith.subf %45, %46 : vector<1x128xf32>
    %cst_30 = arith.constant 9.99999974E-6 : f32
    %48 = vector.broadcast %cst_30 : f32 to vector<1x128xf32>
    %49 = arith.addf %47, %48 : vector<1x128xf32>
    %50 = math.rsqrt %49 : vector<1x128xf32>
    %51 = arith.mulf %19, %50 : vector<1x128xf32>
    %52 = arith.mulf %43, %51 : vector<1x128xf32>
    %53 = arith.subf %20, %52 : vector<1x128xf32>
    %54 = vector.broadcast %51 : vector<1x128xf32> to vector<32x128xf32>
    %55 = arith.mulf %18, %54 : vector<32x128xf32>
    %56 = vector.broadcast %53 : vector<1x128xf32> to vector<32x128xf32>
    %57 = arith.addf %55, %56 : vector<32x128xf32>
    %cst_31 = arith.constant 0.000000e+00 : f32
    %58 = vector.broadcast %cst_31 : f32 to vector<32x128xf32>
    %59 = arith.maximumf %57, %58 : vector<32x128xf32>
    %60 = vector.shape_cast %59 : vector<32x128xf32> to vector<2x16x128xf32>
    %c0_32 = arith.constant 0 : index
    %c1_33 = arith.constant 1 : index
    %c0_34 = arith.constant 0 : index
    %61 = vector.load %arg8[%c0_32, %c1_33, %c0_34] : memref<2x18x128xf32, #tpu.memory_space<vmem>>, vector<2x16x128xf32>
    tpu.vector_store %arg8[%c0_32, %c1_33, %c0_34], %60 {strides = array<i32>} : memref<2x18x128xf32, #tpu.memory_space<vmem>>, vector<2x16x128xf32>,
    %cst_35 = arith.constant 0.000000e+00 : f32
    %62 = vector.broadcast %cst_35 : f32 to vector<2x1x128xf32>
    %c0_36 = arith.constant 0 : index
    %c0_37 = arith.constant 0 : index
    %c0_38 = arith.constant 0 : index
    %63 = vector.load %arg8[%c0_36, %c0_37, %c0_38] : memref<2x18x128xf32, #tpu.memory_space<vmem>>, vector<2x1x128xf32>
    tpu.vector_store %arg8[%c0_36, %c0_37, %c0_38], %62 {strides = array<i32>} : memref<2x18x128xf32, #tpu.memory_space<vmem>>, vector<2x1x128xf32>,
    %c0_39 = arith.constant 0 : index
    %c17 = arith.constant 17 : index
    %c0_40 = arith.constant 0 : index
    %64 = vector.load %arg8[%c0_39, %c17, %c0_40] : memref<2x18x128xf32, #tpu.memory_space<vmem>>, vector<2x1x128xf32>
    tpu.vector_store %arg8[%c0_39, %c17, %c0_40], %62 {strides = array<i32>} : memref<2x18x128xf32, #tpu.memory_space<vmem>>, vector<2x1x128xf32>,
    %c0_41 = arith.constant 0 : index
    %c0_42 = arith.constant 0 : index
    %c0_43 = arith.constant 0 : index
    %65 = vector.load %arg8[%c0_41, %c0_42, %c0_43] : memref<2x18x128xf32, #tpu.memory_space<vmem>>, vector<2x16x128xf32>
    %66 = vector.shape_cast %65 : vector<2x16x128xf32> to vector<32x128xf32>
    %c0_44 = arith.constant 0 : index
    %c1_45 = arith.constant 1 : index
    %c0_46 = arith.constant 0 : index
    %67 = vector.load %arg8[%c0_44, %c1_45, %c0_46] : memref<2x18x128xf32, #tpu.memory_space<vmem>>, vector<2x16x128xf32>
    %68 = vector.shape_cast %67 : vector<2x16x128xf32> to vector<32x128xf32>
    %c0_47 = arith.constant 0 : index
    %c2_48 = arith.constant 2 : index
    %c0_49 = arith.constant 0 : index
    %69 = vector.load %arg8[%c0_47, %c2_48, %c0_49] : memref<2x18x128xf32, #tpu.memory_space<vmem>>, vector<2x16x128xf32>
    %70 = vector.shape_cast %69 : vector<2x16x128xf32> to vector<32x128xf32>
    %cst_50 = arith.constant 0.000000e+00 : f32
    %71 = vector.broadcast %cst_50 : f32 to vector<32x128xf32>
    %c0_51 = arith.constant 0 : index
    %c0_52 = arith.constant 0 : index
    %c0_53 = arith.constant 0 : index
    %72 = vector.load %arg2[%c0_51, %c0_52, %c0_53] : memref<3x128x128xf32, #tpu.memory_space<vmem>>, vector<1x128x128xf32>
    %73 = vector.shape_cast %72 : vector<1x128x128xf32> to vector<128x128xf32>
    %cst_54 = arith.constant dense<0.000000e+00> : vector<32x128xf32>
    %74 = tpu.matmul %66, %73, %cst_54 {dimension_numbers = #tpu.dot_dimension_numbers<[1], [0], [0], [1], [0, 0, 1, 1], [], []>} : vector<32x128xf32>, vector<128x128xf32>, vector<32x128xf32> -> vector<32x128xf32>
    %75 = arith.addf %71, %74 : vector<32x128xf32>
    %c1_55 = arith.constant 1 : index
    %c0_56 = arith.constant 0 : index
    %c0_57 = arith.constant 0 : index
    %76 = vector.load %arg2[%c1_55, %c0_56, %c0_57] : memref<3x128x128xf32, #tpu.memory_space<vmem>>, vector<1x128x128xf32>
    %77 = vector.shape_cast %76 : vector<1x128x128xf32> to vector<128x128xf32>
    %cst_58 = arith.constant dense<0.000000e+00> : vector<32x128xf32>
    %78 = tpu.matmul %68, %77, %cst_58 {dimension_numbers = #tpu.dot_dimension_numbers<[1], [0], [0], [1], [0, 0, 1, 1], [], []>} : vector<32x128xf32>, vector<128x128xf32>, vector<32x128xf32> -> vector<32x128xf32>
    %79 = arith.addf %75, %78 : vector<32x128xf32>
    %c2_59 = arith.constant 2 : index
    %c0_60 = arith.constant 0 : index
    %c0_61 = arith.constant 0 : index
    %80 = vector.load %arg2[%c2_59, %c0_60, %c0_61] : memref<3x128x128xf32, #tpu.memory_space<vmem>>, vector<1x128x128xf32>
    %81 = vector.shape_cast %80 : vector<1x128x128xf32> to vector<128x128xf32>
    %cst_62 = arith.constant dense<0.000000e+00> : vector<32x128xf32>
    %82 = tpu.matmul %70, %81, %cst_62 {dimension_numbers = #tpu.dot_dimension_numbers<[1], [0], [0], [1], [0, 0, 1, 1], [], []>} : vector<32x128xf32>, vector<128x128xf32>, vector<32x128xf32> -> vector<32x128xf32>
    %83 = arith.addf %79, %82 : vector<32x128xf32>
    %c0_63 = arith.constant 0 : index
    %c0_64 = arith.constant 0 : index
    %84 = vector.load %arg5[%c0_63, %c0_64] : memref<1x128xf32, #tpu.memory_space<vmem>>, vector<1x128xf32>
    %c0_65 = arith.constant 0 : index
    %c0_66 = arith.constant 0 : index
    %85 = vector.load %arg6[%c0_65, %c0_66] : memref<1x128xf32, #tpu.memory_space<vmem>>, vector<1x128xf32>
    %cst_67 = arith.constant dense<0.000000e+00> : vector<128xf32>
    %86 = vector.multi_reduction <add>, %83, %cst_67 [0] : vector<32x128xf32> to vector<128xf32>
    %87 = vector.shape_cast %86 : vector<128xf32> to vector<1x128xf32>
    %c8_i32_68 = arith.constant 8 : i32
    %88 = tpu.dynamic_rotate %87 by %c8_i32_68 dim 1 : vector<1x128xf32>, i32 -> vector<1x128xf32>
    %89 = arith.addf %87, %88 : vector<1x128xf32>
    %c16_i32_69 = arith.constant 16 : i32
    %90 = tpu.dynamic_rotate %89 by %c16_i32_69 dim 1 : vector<1x128xf32>, i32 -> vector<1x128xf32>
    %91 = arith.addf %89, %90 : vector<1x128xf32>
    %c32_i32_70 = arith.constant 32 : i32
    %92 = tpu.dynamic_rotate %91 by %c32_i32_70 dim 1 : vector<1x128xf32>, i32 -> vector<1x128xf32>
    %93 = arith.addf %91, %92 : vector<1x128xf32>
    %c64_i32_71 = arith.constant 64 : i32
    %94 = tpu.dynamic_rotate %93 by %c64_i32_71 dim 1 : vector<1x128xf32>, i32 -> vector<1x128xf32>
    %95 = arith.addf %93, %94 : vector<1x128xf32>
    %96 = arith.mulf %83, %83 : vector<32x128xf32>
    %cst_72 = arith.constant dense<0.000000e+00> : vector<128xf32>
    %97 = vector.multi_reduction <add>, %96, %cst_72 [0] : vector<32x128xf32> to vector<128xf32>
    %98 = vector.shape_cast %97 : vector<128xf32> to vector<1x128xf32>
    %c8_i32_73 = arith.constant 8 : i32
    %99 = tpu.dynamic_rotate %98 by %c8_i32_73 dim 1 : vector<1x128xf32>, i32 -> vector<1x128xf32>
    %100 = arith.addf %98, %99 : vector<1x128xf32>
    %c16_i32_74 = arith.constant 16 : i32
    %101 = tpu.dynamic_rotate %100 by %c16_i32_74 dim 1 : vector<1x128xf32>, i32 -> vector<1x128xf32>
    %102 = arith.addf %100, %101 : vector<1x128xf32>
    %c32_i32_75 = arith.constant 32 : i32
    %103 = tpu.dynamic_rotate %102 by %c32_i32_75 dim 1 : vector<1x128xf32>, i32 -> vector<1x128xf32>
    %104 = arith.addf %102, %103 : vector<1x128xf32>
    %c64_i32_76 = arith.constant 64 : i32
    %105 = tpu.dynamic_rotate %104 by %c64_i32_76 dim 1 : vector<1x128xf32>, i32 -> vector<1x128xf32>
    %106 = arith.addf %104, %105 : vector<1x128xf32>
    %cst_77 = arith.constant 0.001953125 : f32
    %107 = vector.broadcast %cst_77 : f32 to vector<1x128xf32>
    %108 = arith.mulf %95, %107 : vector<1x128xf32>
    %cst_78 = arith.constant 0.001953125 : f32
    %109 = vector.broadcast %cst_78 : f32 to vector<1x128xf32>
    %110 = arith.mulf %106, %109 : vector<1x128xf32>
    %111 = arith.mulf %108, %108 : vector<1x128xf32>
    %112 = arith.subf %110, %111 : vector<1x128xf32>
    %cst_79 = arith.constant 9.99999974E-6 : f32
    %113 = vector.broadcast %cst_79 : f32 to vector<1x128xf32>
    %114 = arith.addf %112, %113 : vector<1x128xf32>
    %115 = math.rsqrt %114 : vector<1x128xf32>
    %116 = arith.mulf %84, %115 : vector<1x128xf32>
    %117 = arith.mulf %108, %116 : vector<1x128xf32>
    %118 = arith.subf %85, %117 : vector<1x128xf32>
    %119 = vector.broadcast %116 : vector<1x128xf32> to vector<32x128xf32>
    %120 = arith.mulf %83, %119 : vector<32x128xf32>
    %121 = vector.broadcast %118 : vector<1x128xf32> to vector<32x128xf32>
    %122 = arith.addf %120, %121 : vector<32x128xf32>
    %123 = arith.addf %122, %3 : vector<32x128xf32>
    %cst_80 = arith.constant 0.000000e+00 : f32
    %124 = vector.broadcast %cst_80 : f32 to vector<32x128xf32>
    %125 = arith.maximumf %123, %124 : vector<32x128xf32>
    %c0_81 = arith.constant 0 : index
    %c0_82 = arith.constant 0 : index
    %126 = vector.load %arg7[%c0_81, %c0_82] : memref<32x128xf32, #tpu.memory_space<vmem>>, vector<32x128xf32>
    tpu.vector_store %arg7[%c0_81, %c0_82], %125 {strides = array<i32>} : memref<32x128xf32, #tpu.memory_space<vmem>>, vector<32x128xf32>,
    return
  }
}

</mosaic_0001>

<bundles_post_ra>
// kernel: tpu_custom_call.1
= control target key start
LH: loop header
LB: loop body
LE: loop exit
PB: predicated region body
PF: predicated region fallthrough
CT: control target
= control target key end

     0   :  { %12 = vsyncpa [#allocation4], 0  ;;  %s1517_s0 = inlined_call_operand.vmem [shape: f32[2,18,128], index: 0, kind: input, shape index: {}]   ;;  %s1518_s1 = inlined_call_operand.hbm [shape: f32[3,128,128], index: 1, kind: input, shape index: {}]   ;;  %s1519_s2 = inlined_call_operand.hbm [shape: f32[3,128,128], index: 2, kind: input, shape index: {}]   ;;  %s1520_s3 = inlined_call_operand.vmem [shape: f32[1,128], index: 3, kind: input, shape index: {}]   ;;  %s1521_s4 = inlined_call_operand.vmem [shape: f32[1,128], index: 4, kind: input, shape index: {}]   ;;  %s1522_s5 = inlined_call_operand.vmem [shape: f32[1,128], index: 5, kind: input, shape index: {}]   ;;  %s1523_s6 = inlined_call_operand.vmem [shape: f32[1,128], index: 6, kind: input, shape index: {}]   ;;  %s1524_s7 = inlined_call_operand.hbm [shape: f32[32,128], index: 7, kind: output, shape index: {}]  }
   0x1   :  { %13 = vsyncpa [#allocation7], 0 }
   0x2   :  { %14 = vsyncpa [#allocation5], 0  ;;  %s1320_s24 = smov [#allocation3]  }
   0x3   :  { %s22_s25 = sshll.u32 %s1320_s24, 4  ;;  %s23_s25 = int_to_ptr.vmem [resolvable:$true] %s22_s25 }
   0x4   :  { %s1262_s26 = scalar_lea.vmem %s23_s25, 6144  ;;  %p1267_p1 = scmp.lt.s32.totalorder %s23_s25, %s23_s25 }
   0x5   :  { %p1263_p0 = scmp.ne.s32.totalorder %s23_s25, %s1262_s26  ;;  %p1268_p2 = scmp.lt.s32.totalorder %s1262_s26, %s1262_s26 }
   0x7   :  { %p1269_p3 = por %p1268_p2, %p1267_p1 }
   0x9   :  { %p1270_p4 = pnand %p1269_p3, %p1263_p0 }
   0xb   :  { %1273 = shalt.err (!%p1270_p4)
}
   0xc   :  { %s1321_s27 = smov 128   ;;  %s1322_s28 = smov 8  }
   0xd   :  { %28 = dma.hbm_to_vmem [thread:$0]  %s1518_s1, 6144, %s23_s25, [#allocation4], %s1321_s27, %s1321_s27, %s1322_s28  }
   0xe   :  { %s1323_s8 = smov [#allocation6]  }
   0xf   :  { %s34_s9 = sshll.u32 %s1323_s8, 4  ;;  %s35_s9 = int_to_ptr.vmem [resolvable:$true] %s34_s9 }
  0x10   :  { %s1282_s10 = scalar_lea.vmem %s35_s9, 6144  ;;  %p1287_p6 = scmp.lt.s32.totalorder %s35_s9, %s35_s9 }
  0x11   :  { %p1283_p5 = scmp.ne.s32.totalorder %s35_s9, %s1282_s10  ;;  %p1288_p7 = scmp.lt.s32.totalorder %s1282_s10, %s1282_s10 }
  0x13   :  { %p1289_p8 = por %p1288_p7, %p1287_p6 }
  0x15   :  { %p1290_p9 = pnand %p1289_p8, %p1283_p5 }
  0x17   :  { %1293 = shalt.err (!%p1290_p9)
}
  0x18   :  { %40 = dma.hbm_to_vmem [thread:$0]  %s1519_s2, 6144, %s35_s9, [#allocation7], %s1321_s27, %s1321_s27, %s1322_s28  }
  0x19   :  { %1314 = dma.done.wait [#allocation4], 6144  }
  0x1a   :  { %1315 = vsyncadd [#allocation4], 4294961152 }
  0x1b   :  { %1316 = dma.done.wait [#allocation7], 6144  }
  0x1c   :  { %1317 = vsyncadd [#allocation7], 4294961152  ;;  %v99_v0 = vld [vmem:[#allocation3 + $0xf8] sm:$0xff]  ;;  %v98_v2 = vld [vmem:[#allocation3 + $0xf0] sm:$0xff]  ;;  %s1325_s2 = smov 32   ;;  %s1326_s13 = smov 64  }
  0x1d   :  { %v82_v1 = vld [vmem:[#allocation3 + $0x78] sm:$0xff]  ;;  %1013 = vmatprep.subr.mxu0 %v99_v0  ;;  %v81_v3 = vld [vmem:[#allocation3 + $0x70] sm:$0xff]  ;;  %v97_v4 = vld [vmem:[#allocation3 + $0xe8] sm:$0xff] }
  0x1e   :  { %1051 = vmatprep.subr.mxu1 %v82_v1  ;;  %1014 = vmatpush3.msra.mxu0 %v99_v0  ;;  %v80_v5 = vld [vmem:[#allocation3 + $0x68] sm:$0xff]  ;;  %v96_v6 = vld [vmem:[#allocation3 + $0xe0] sm:$0xff]  ;;  %v95_v8 = vld [vmem:[#allocation3 + $0xd8] sm:$0xff] }
  0x1f   :  { %1052 = vmatpush3.msra.mxu1 %v82_v1  ;;  %1015 = vmatprep.subr.mxu0 %v98_v2  ;;  %v79_v7 = vld [vmem:[#allocation3 + $0x60] sm:$0xff]  ;;  %v78_v9 = vld [vmem:[#allocation3 + $0x58] sm:$0xff]  ;;  %v94_v10 = vld [vmem:[#allocation3 + $0xd0] sm:$0xff] }
  0x20   :  { %1053 = vmatprep.subr.mxu1 %v81_v3  ;;  %1016 = vmatpush3.msra.mxu0 %v98_v2  ;;  %v77_v11 = vld [vmem:[#allocation3 + $0x50] sm:$0xff]  ;;  %v93_v12 = vld [vmem:[#allocation3 + $0xc8] sm:$0xff]  ;;  %v92_v14 = vld [vmem:[#allocation3 + $0xc0] sm:$0xff] }
  0x21   :  { %1054 = vmatpush3.msra.mxu1 %v81_v3  ;;  %1017 = vmatprep.subr.mxu0 %v97_v4  ;;  %v76_v13 = vld [vmem:[#allocation3 + $0x48] sm:$0xff]  ;;  %v75_v15 = vld [vmem:[#allocation3 + $0x40] sm:$0xff]  ;;  %v91_v16 = vld [vmem:[#allocation3 + $0xb8] sm:$0xff] }
  0x22   :  { %1055 = vmatprep.subr.mxu1 %v80_v5  ;;  %1018 = vmatpush3.msra.mxu0 %v97_v4  ;;  %v74_v17 = vld [vmem:[#allocation3 + $0x38] sm:$0xff]  ;;  %v90_v18 = vld [vmem:[#allocation3 + $0xb0] sm:$0xff]  ;;  %v89_v20 = vld [vmem:[#allocation3 + $0xa8] sm:$0xff] }
  0x23   :  { %1056 = vmatpush3.msra.mxu1 %v80_v5  ;;  %1019 = vmatprep.subr.mxu0 %v96_v6  ;;  %v73_v19 = vld [vmem:[#allocation3 + $0x30] sm:$0xff]  ;;  %v72_v21 = vld [vmem:[#allocation3 + $0x28] sm:$0xff]  ;;  %v88_v22 = vld [vmem:[#allocation3 + $0xa0] sm:$0xff] }
  0x24   :  { %1057 = vmatprep.subr.mxu1 %v79_v7  ;;  %1020 = vmatpush3.msra.mxu0 %v96_v6  ;;  %v71_v23 = vld [vmem:[#allocation3 + $0x20] sm:$0xff]  ;;  %v87_v24 = vld [vmem:[#allocation3 + $0x98] sm:$0xff]  ;;  %v86_v26 = vld [vmem:[#allocation3 + $0x90] sm:$0xff] }
  0x25   :  { %1058 = vmatpush3.msra.mxu1 %v79_v7  ;;  %1021 = vmatprep.subr.mxu0 %v95_v8  ;;  %v70_v25 = vld [vmem:[#allocation3 + $0x18] sm:$0xff]  ;;  %v69_v27 = vld [vmem:[#allocation3 + $0x10] sm:$0xff]  ;;  %v85_v28 = vld [vmem:[#allocation3 + $0x88] sm:$0xff] }
  0x26   :  { %1059 = vmatprep.subr.mxu1 %v78_v9  ;;  %1022 = vmatpush3.msra.mxu0 %v95_v8  ;;  %v68_v29 = vld [vmem:[#allocation3 + $0x8] sm:$0xff]  ;;  %v84_v30 = vld [vmem:[#allocation3 + $0x80] sm:$0xff]  ;;  %v1384_v32 = vld [vmem:[%s1517_s0 + $0x1] sm:$0xff] }
  0x27   :  { %1060 = vmatpush3.msra.mxu1 %v78_v9  ;;  %1023 = vmatprep.subr.mxu0 %v94_v10  ;;  %v67_v31 = vld [vmem:[#allocation3] sm:$0xff]  ;;  %v55_v33 = vld [vmem:[%s1517_s0] sm:$0xff]  ;;  %v56_v35 = vld [vmem:[%s1517_s0 + $0x8] sm:$0xff] }
  0x28   :  { %1061 = vmatprep.subr.mxu1 %v77_v11  ;;  %1024 = vmatpush3.msra.mxu0 %v94_v10  ;;  %v1392_v34 = vld [vmem:[%s1517_s0 + $0x9] sm:$0xff]  ;;  %v1401_v37 = vld [vmem:[%s1517_s0 + $0x19] sm:$0xff]  ;;  %v1414_v42 = vld [vmem:[%s1517_s0 + $0x21] sm:$0xff] }
  0x29   :  { %1062 = vmatpush3.msra.mxu1 %v77_v11  ;;  %1025 = vmatprep.subr.mxu0 %v93_v12  ;;  %v286_v36 = vld [vmem:[#allocation3 + $0x178] sm:$0xff]  ;;  %v57_v38 = vld [vmem:[%s1517_s0 + $0x18] sm:$0xff]  ;;  %v285_v39 = vld [vmem:[#allocation3 + $0x170] sm:$0xff] }
  0x2a   :  { %1063 = vmatprep.subr.mxu1 %v76_v13  ;;  %1026 = vmatpush3.msra.mxu0 %v93_v12  ;;  %v58_v40 = vld [vmem:[%s1517_s0 + $0x20] sm:$0xff]  ;;  %v284_v41 = vld [vmem:[#allocation3 + $0x168] sm:$0xff]  ;;  %v283_v44 = vld [vmem:[#allocation3 + $0x160] sm:$0xff] }
  0x2b   :  { %1064 = vmatpush3.msra.mxu1 %v76_v13  ;;  %1027 = vmatprep.subr.mxu0 %v92_v14  ;;  %v63_v43 = vld [vmem:[%s1517_s0 + $0x2] sm:$0xff]  ;;  %v280_v47 = vld [vmem:[#allocation3 + $0x148] sm:$0xff]  ;;  %v279_v48 = vld [vmem:[#allocation3 + $0x140] sm:$0xff] }
  0x2c   :  { %1065 = vmatprep.subr.mxu1 %v75_v15  ;;  %1028 = vmatpush3.msra.mxu0 %v92_v14  ;;  %v282_v45 = vld [vmem:[#allocation3 + $0x158] sm:$0xff]  ;;  %v281_v46 = vld [vmem:[#allocation3 + $0x150] sm:$0xff]  ;;  %v276_v51 = vld [vmem:[#allocation3 + $0x128] sm:$0xff] }
  0x2d   :  { %1066 = vmatpush3.msra.mxu1 %v75_v15  ;;  %1029 = vmatprep.subr.mxu0 %v91_v16  ;;  %v278_v49 = vld [vmem:[#allocation3 + $0x138] sm:$0xff]  ;;  %v277_v50 = vld [vmem:[#allocation3 + $0x130] sm:$0xff]  ;;  %v275_v52 = vld [vmem:[#allocation3 + $0x120] sm:$0xff] }
  0x2e   :  { %1067 = vmatprep.subr.mxu1 %v74_v17  ;;  %1030 = vmatpush3.msra.mxu0 %v91_v16  ;;  %v274_v53 = vld [vmem:[#allocation3 + $0x118] sm:$0xff]  ;;  %v273_v54 = vld [vmem:[#allocation3 + $0x110] sm:$0xff]  ;;  %v272_v55 = vld [vmem:[#allocation3 + $0x108] sm:$0xff] }
  0x2f   :  { %1068 = vmatpush3.msra.mxu1 %v74_v17  ;;  %1031 = vmatprep.subr.mxu0 %v90_v18  ;;  %v271_v56 = vld [vmem:[#allocation3 + $0x100] sm:$0xff]  ;;  %v65_v58 = vld [vmem:[%s1517_s0 + $0x1a] sm:$0xff]  ;;  %v66_v59 = vld [vmem:[%s1517_s0 + $0x22] sm:$0xff] }
  0x30   :  { %1069 = vmatprep.subr.mxu1 %v73_v19  ;;  %1032 = vmatpush3.msra.mxu0 %v90_v18  ;;  %v64_v57 = vld [vmem:[%s1517_s0 + $0xa] sm:$0xff]  ;;  %s1324_s0 = smov 16  }
  0x31   :  { %1070 = vmatpush3.msra.mxu1 %v73_v19  ;;  %1033 = vmatprep.subr.mxu0 %v89_v20 }
  0x32   :  { %1071 = vmatprep.subr.mxu1 %v72_v21  ;;  %1034 = vmatpush3.msra.mxu0 %v89_v20 }
  0x33   :  { %1072 = vmatpush3.msra.mxu1 %v72_v21  ;;  %1035 = vmatprep.subr.mxu0 %v88_v22 }
  0x34   :  { %1073 = vmatprep.subr.mxu1 %v71_v23  ;;  %1036 = vmatpush3.msra.mxu0 %v88_v22 }
  0x35   :  { %1074 = vmatpush3.msra.mxu1 %v71_v23  ;;  %1037 = vmatprep.subr.mxu0 %v87_v24 }
  0x36   :  { %1075 = vmatprep.subr.mxu1 %v70_v25  ;;  %1038 = vmatpush3.msra.mxu0 %v87_v24 }
  0x37   :  { %1076 = vmatpush3.msra.mxu1 %v70_v25  ;;  %1039 = vmatprep.subr.mxu0 %v86_v26 }
  0x38   :  { %1077 = vmatprep.subr.mxu1 %v69_v27  ;;  %1040 = vmatpush3.msra.mxu0 %v86_v26 }
  0x39   :  { %1078 = vmatpush3.msra.mxu1 %v69_v27  ;;  %1041 = vmatprep.subr.mxu0 %v85_v28 }
  0x3a   :  { %1079 = vmatprep.subr.mxu1 %v68_v29  ;;  %1042 = vmatpush3.msra.mxu0 %v85_v28 }
  0x3b   :  { %1080 = vmatpush3.msra.mxu1 %v68_v29  ;;  %1043 = vmatprep.subr.mxu0 %v84_v30 }
  0x3c   :  { %1081 = vmatprep.subr.mxu1 %v67_v31  ;;  %1044 = vmatpush3.msra.mxu0 %v84_v30 }
  0x3d   :  { %1045 = vmatprep.mubr.f32.mxu0 %v1384_v32  ;;  %1082 = vmatpush3.msra.mxu1 %v67_v31 }
  0x3e   :  { %1083 = vmatprep.mubr.f32.mxu1 %v55_v33  ;;  %1046 = vmatmul.mubr.f32.vlgmr.msra.gmra.mxu0 %v1392_v34 }
  0x3f   :  { %1084 = vmatmul.mubr.f32.vlgmr.msra.gmra.mxu1 %v56_v35  ;;  %1089 = vmatprep.subr.mxu0 %v286_v36 }
  0x40   :  { %1048 = vmatprep.mubr.f32.mxu0 %v1401_v37  ;;  %1090 = vmatpush3.msra.mxu0 %v286_v36 }
  0x41   :  { %1086 = vmatprep.mubr.f32.mxu1 %v57_v38  ;;  %1091 = vmatprep.subr.mxu0 %v285_v39 }
  0x42   :  { %1092 = vmatpush3.msra.mxu0 %v285_v39 }
  0x43   :  { %1087 = vmatmul.mubr.f32.gmra.mxu1 %v58_v40  ;;  %1093 = vmatprep.subr.mxu0 %v284_v41 }
  0x44   :  { %1049 = vmatmul.mubr.f32.gmra.mxu0 %v1414_v42 }
  0x45   :  { %1094 = vmatpush3.msra.mxu0 %v284_v41  ;;  %1121 = vmatprep.mubr.f32.mxu0 %v63_v43 }
  0x46   :  { %1095 = vmatprep.subr.mxu0 %v283_v44 }
  0x47   :  { %1096 = vmatpush3.msra.mxu0 %v283_v44 }
  0x48   :  { %1097 = vmatprep.subr.mxu0 %v282_v45 }
  0x49   :  { %1098 = vmatpush3.msra.mxu0 %v282_v45 }
  0x4a   :  { %1099 = vmatprep.subr.mxu0 %v281_v46 }
  0x4b   :  { %1100 = vmatpush3.msra.mxu0 %v281_v46 }
  0x4c   :  { %1101 = vmatprep.subr.mxu0 %v280_v47 }
  0x4d   :  { %1102 = vmatpush3.msra.mxu0 %v280_v47 }
  0x4e   :  { %1103 = vmatprep.subr.mxu0 %v279_v48 }
  0x4f   :  { %1104 = vmatpush3.msra.mxu0 %v279_v48 }
  0x50   :  { %1105 = vmatprep.subr.mxu0 %v278_v49 }
  0x51   :  { %1106 = vmatpush3.msra.mxu0 %v278_v49 }
  0x52   :  { %1107 = vmatprep.subr.mxu0 %v277_v50 }
  0x53   :  { %1108 = vmatpush3.msra.mxu0 %v277_v50  ;;  %v509_v50 = vld [vmem:[#allocation6 + $0xf8] sm:$0xff] }
  0x54   :  { %1109 = vmatprep.subr.mxu0 %v276_v51  ;;  %1127 = vmatprep.subr.mxu1 %v509_v50 }
  0x55   :  { %1110 = vmatpush3.msra.mxu0 %v276_v51  ;;  %1128 = vmatpush3.msra.mxu1 %v509_v50  ;;  %v508_v51 = vld [vmem:[#allocation6 + $0xf0] sm:$0xff] }
  0x56   :  { %1111 = vmatprep.subr.mxu0 %v275_v52  ;;  %1129 = vmatprep.subr.mxu1 %v508_v51 }
  0x57   :  { %1112 = vmatpush3.msra.mxu0 %v275_v52  ;;  %1130 = vmatpush3.msra.mxu1 %v508_v51 }
  0x58   :  { %1113 = vmatprep.subr.mxu0 %v274_v53 }
  0x59   :  { %1114 = vmatpush3.msra.mxu0 %v274_v53  ;;  %v507_v53 = vld [vmem:[#allocation6 + $0xe8] sm:$0xff] }
  0x5a   :  { %1115 = vmatprep.subr.mxu0 %v273_v54  ;;  %1131 = vmatprep.subr.mxu1 %v507_v53 }
  0x5b   :  { %1116 = vmatpush3.msra.mxu0 %v273_v54  ;;  %1132 = vmatpush3.msra.mxu1 %v507_v53 }
  0x5c   :  { %1117 = vmatprep.subr.mxu0 %v272_v55 }
  0x5d   :  { %1118 = vmatpush3.msra.mxu0 %v272_v55  ;;  %v506_v55 = vld [vmem:[#allocation6 + $0xe0] sm:$0xff] }
  0x5e   :  { %1119 = vmatprep.subr.mxu0 %v271_v56  ;;  %1133 = vmatprep.subr.mxu1 %v506_v55 }
  0x5f   :  { %1120 = vmatpush3.msra.mxu0 %v271_v56  ;;  %1134 = vmatpush3.msra.mxu1 %v506_v55 }
  0x60   :  { %1122 = vmatmul.mubr.f32.vlgmr.msra.gmra.mxu0 %v64_v57  ;;  %v505_v57 = vld [vmem:[#allocation6 + $0xd8] sm:$0xff] }
  0x61   :  { %1124 = vmatprep.mubr.f32.mxu0 %v65_v58  ;;  %1135 = vmatprep.subr.mxu1 %v505_v57 }
  0x62   :  { %1136 = vmatpush3.msra.mxu1 %v505_v57 }
  0x64   :  { %1125 = vmatmul.mubr.f32.gmra.mxu0 %v66_v59  ;;  %v492_v59 = vld [vmem:[#allocation6 + $0x78] sm:$0xff] }
  0x65   :  { %1165 = vmatprep.subr.mxu0 %v492_v59 }
  0x66   :  { %1166 = vmatpush3.msra.mxu0 %v492_v59 }
  0xfe   :  { %v1047_v60 = vpop.f32.mrf.mxu0 }
  0xff   :  { %v1085_v61 = vpop.f32.mrf.mxu1 }
 0x100   :  { %v166_v62 = vpop.f32.mrf.mxu0  ;;  %v257_v4 = vadd.f32 %v1085_v61, %v1047_v60  ;;  %v504_v60 = vld [vmem:[#allocation6 + $0xd0] sm:$0xff] }
 0x101   :  { %v251_v0 = vpop.f32.mrf.mxu1  ;;  %v491_v61 = vld [vmem:[#allocation6 + $0x70] sm:$0xff]  ;;  %1137 = vmatprep.subr.mxu1 %v504_v60 }
 0x102   :  { %v252_v5 = vadd.f32 %v251_v0, %v166_v62  ;;  %1167 = vmatprep.subr.mxu0 %v491_v61  ;;  %v503_v62 = vld [vmem:[#allocation6 + $0xc8] sm:$0xff]  ;;  %1138 = vmatpush3.msra.mxu1 %v504_v60  ;;  %v502_v0 = vld [vmem:[#allocation6 + $0xc0] sm:$0xff] }
 0x103   :  { %v1088_v1 = vpop.f32.mrf.mxu1  ;;  %1168 = vmatpush3.msra.mxu0 %v491_v61  ;;  %1139 = vmatprep.subr.mxu1 %v503_v62 }
 0x104   :  { %v1050_v63 = vpop.f32.mrf.mxu0  ;;  %1140 = vmatpush3.msra.mxu1 %v503_v62 }
 0x105   :  { %v261_v6 = vpop.f32.mrf.mxu1  ;;  %v267_v11 = vadd.f32 %v1088_v1, %v1050_v63  ;;  %v490_v63 = vld [vmem:[#allocation6 + $0x68] sm:$0xff]  ;;  %v489_v1 = vld [vmem:[#allocation6 + $0x60] sm:$0xff]  ;;  %1141 = vmatprep.subr.mxu1 %v502_v0 }
 0x106   :  { %v176_v2 = vpop.f32.mrf.mxu0  ;;  %1169 = vmatprep.subr.mxu0 %v490_v63  ;;  %1142 = vmatpush3.msra.mxu1 %v502_v0 }
 0x107   :  { %v262_v12 = vadd.f32 %v261_v6, %v176_v2  ;;  %1170 = vmatpush3.msra.mxu0 %v490_v63  ;;  %v501_v2 = vld [vmem:[#allocation6 + $0xb8] sm:$0xff]  ;;  %v499_v6 = vld [vmem:[#allocation6 + $0xa8] sm:$0xff] }
 0x108   :  { %1171 = vmatprep.subr.mxu0 %v489_v1  ;;  %1143 = vmatprep.subr.mxu1 %v501_v2 }
 0x109   :  { %1172 = vmatpush3.msra.mxu0 %v489_v1  ;;  %1144 = vmatpush3.msra.mxu1 %v501_v2  ;;  %v692_v1 = vld [vmem:[#allocation6 + $0x158] sm:$0xff] }
 0x120   :  { %v1123_v3 = vpop.f32.mrf.mxu0 }
 0x121   :  { %v1429_v8 = vadd.f32 %v1123_v3, %v257_v4  ;;  %v488_v3 = vld [vmem:[#allocation6 + $0x58] sm:$0xff]  ;;  %v500_v4 = vld [vmem:[#allocation6 + $0xb0] sm:$0xff] }
 0x122   :  { %v353_v7 = vpop.f32.mrf.mxu0  ;;  %1173 = vmatprep.subr.mxu0 %v488_v3  ;;  %1145 = vmatprep.subr.mxu1 %v500_v4 }
 0x123   :  { %v1431_v9 = vadd.f32 %v353_v7, %v252_v5  ;;  %v400_v15 = vmul.f32 %v1429_v8, %v1429_v8  ;;  %1174 = vmatpush3.msra.mxu0 %v488_v3  ;;  %v487_v5 = vld [vmem:[#allocation6 + $0x50] sm:$0xff]  ;;  %v486_v7 = vld [vmem:[#allocation6 + $0x48] sm:$0xff]  ;;  %1146 = vmatpush3.msra.mxu1 %v500_v4 }
 0x124   :  { %v1126_v10 = vpop.f32.mrf.mxu0  ;;  %1175 = vmatprep.subr.mxu0 %v487_v5  ;;  %1147 = vmatprep.subr.mxu1 %v499_v6  ;;  %v691_v4 = vld [vmem:[#allocation6 + $0x150] sm:$0xff] }
 0x125   :  { %v399_v13 = vmul.f32 %v1431_v9, %v1431_v9  ;;  %v378_v16 = vadd.f32 %v1429_v8, %v1431_v9  ;;  %v1439_v17 = vadd.f32 %v1126_v10, %v267_v11  ;;  %1176 = vmatpush3.msra.mxu0 %v487_v5  ;;  %v498_v10 = vld [vmem:[#allocation6 + $0xa0] sm:$0xff]  ;;  %1148 = vmatpush3.msra.mxu1 %v499_v6  ;;  %v690_v5 = vld [vmem:[#allocation6 + $0x148] sm:$0xff] }
 0x126   :  { %v363_v14 = vpop.f32.mrf.mxu0  ;;  %1177 = vmatprep.subr.mxu0 %v486_v7  ;;  %v485_v11 = vld [vmem:[#allocation6 + $0x40] sm:$0xff]  ;;  %1149 = vmatprep.subr.mxu1 %v498_v10 }
 0x127   :  { %v1441_v18 = vadd.f32 %v363_v14, %v262_v12  ;;  %v403_v19 = vadd.f32 %v400_v15, %v399_v13  ;;  %v402_v22 = vmul.f32 %v1439_v17, %v1439_v17  ;;  %1178 = vmatpush3.msra.mxu0 %v486_v7  ;;  %v497_v12 = vld [vmem:[#allocation6 + $0x98] sm:$0xff]  ;;  %1150 = vmatpush3.msra.mxu1 %v498_v10  ;;  %v496_v14 = vld [vmem:[#allocation6 + $0x90] sm:$0xff]  ;;  %v689_v7 = vld [vmem:[#allocation6 + $0x140] sm:$0xff] }
 0x128   :  { %1179 = vmatprep.subr.mxu0 %v485_v11  ;;  %v484_v13 = vld [vmem:[#allocation6 + $0x38] sm:$0xff]  ;;  %1151 = vmatprep.subr.mxu1 %v497_v12  ;;  %v483_v15 = vld [vmem:[#allocation6 + $0x30] sm:$0xff] }
 0x129   :  { %v379_v20 = vadd.f32 %v378_v16, %v1441_v18  ;;  %v401_v21 = vmul.f32 %v1441_v18, %v1441_v18  ;;  %1180 = vmatpush3.msra.mxu0 %v485_v11  ;;  %1152 = vmatpush3.msra.mxu1 %v497_v12  ;;  %v495_v16 = vld [vmem:[#allocation6 + $0x88] sm:$0xff]  ;;  %v688_v10 = vld [vmem:[#allocation6 + $0x138] sm:$0xff]  ;;  %v687_v11 = vld [vmem:[#allocation6 + $0x130] sm:$0xff] }
 0x12a   :  { %1181 = vmatprep.subr.mxu0 %v484_v13  ;;  %1153 = vmatprep.subr.mxu1 %v496_v14  ;;  %v686_v12 = vld [vmem:[#allocation6 + $0x128] sm:$0xff] }
 0x12b   :  { %v380_v23 = vadd.f32 %v379_v20, %v1439_v17  ;;  %v404_v24 = vadd.f32 %v403_v19, %v401_v21  ;;  %1182 = vmatpush3.msra.mxu0 %v484_v13  ;;  %v482_v19 = vld [vmem:[#allocation6 + $0x28] sm:$0xff]  ;;  %1154 = vmatpush3.msra.mxu1 %v496_v14  ;;  %v494_v20 = vld [vmem:[#allocation6 + $0x80] sm:$0xff]  ;;  %v684_v14 = vld [vmem:[#allocation6 + $0x118] sm:$0xff] }
 0x12c   :  { %1183 = vmatprep.subr.mxu0 %v483_v15  ;;  %1155 = vmatprep.subr.mxu1 %v495_v16  ;;  %v481_v21 = vld [vmem:[#allocation6 + $0x20] sm:$0xff] }
 0x12d   :  { %v381_v25 = vrot.slane %v380_v23, 4  ;;  %v405_v26 = vadd.f32 %v404_v24, %v402_v22  ;;  %1184 = vmatpush3.msra.mxu0 %v483_v15  ;;  %1156 = vmatpush3.msra.mxu1 %v495_v16  ;;  %v480_v22 = vld [vmem:[#allocation6 + $0x18] sm:$0xff]  ;;  %v1327_v24 = vmov 0.0   ;;  %v685_v13 = vld [vmem:[#allocation6 + $0x120] sm:$0xff]  ;;  %v683_v15 = vld [vmem:[#allocation6 + $0x110] sm:$0xff] }
 0x12e   :  { %1185 = vmatprep.subr.mxu0 %v482_v19  ;;  %1157 = vmatprep.subr.mxu1 %v494_v20  ;;  %461 = vst [vmem:[#allocation2] sm:$0x1] %v1327_v24  ;;  %462 = vst [vmem:[#allocation2 + $0x18] sm:$0x1] %v1327_v24  ;;  %v682_v16 = vld [vmem:[#allocation6 + $0x108] sm:$0xff] }
 0x12f   :  { %v382_v27 = vadd.f32 %v381_v25, %v380_v23  ;;  %v406_v28 = vrot.slane %v405_v26, 4  ;;  %1186 = vmatpush3.msra.mxu0 %v482_v19  ;;  %v479_v23 = vld [vmem:[#allocation6 + $0x10] sm:$0xff]  ;;  %1158 = vmatpush3.msra.mxu1 %v494_v20  ;;  %463 = vst [vmem:[#allocation2 + $0x11] sm:$0x1] %v1327_v24  ;;  %464 = vst [vmem:[#allocation2 + $0x29] sm:$0x1] %v1327_v24 }
 0x130   :  { %1187 = vmatprep.subr.mxu0 %v481_v21  ;;  %v696_v25 = vld [vmem:[#allocation6 + $0x178] sm:$0xff]  ;;  %v681_v19 = vld [vmem:[#allocation6 + $0x100] sm:$0xff] }
 0x131   :  { %v383_v29 = vrot.slane %v382_v27, 2  ;;  %v407_v30 = vadd.f32 %v406_v28, %v405_v26  ;;  %1188 = vmatpush3.msra.mxu0 %v481_v21  ;;  %1203 = vmatprep.subr.mxu1 %v696_v25  ;;  %v478_v26 = vld [vmem:[#allocation6 + $0x8] sm:$0xff] }
 0x132   :  { %1189 = vmatprep.subr.mxu0 %v480_v22 }
 0x133   :  { %v384_v31 = vadd.f32 %v383_v29, %v382_v27  ;;  %v408_v33 = vrot.slane %v407_v30, 2  ;;  %1190 = vmatpush3.msra.mxu0 %v480_v22  ;;  %v477_v27 = vld [vmem:[#allocation6] sm:$0xff] }
 0x134   :  { %1191 = vmatprep.subr.mxu0 %v479_v23 }
 0x135   :  { %v385_v35 = vrot.slane %v384_v31, 1  ;;  %v409_v36 = vadd.f32 %v408_v33, %v407_v30  ;;  %1192 = vmatpush3.msra.mxu0 %v479_v23 }
 0x136   :  { %1193 = vmatprep.subr.mxu0 %v478_v26 }
 0x137   :  { %v386_v38 = vadd.f32 %v385_v35, %v384_v31  ;;  %v410_v39 = vrot.slane %v409_v36, 1  ;;  %1194 = vmatpush3.msra.mxu0 %v478_v26 }
 0x138   :  { %1195 = vmatprep.subr.mxu0 %v477_v27 }
 0x139   :  { %387 = vrot.lane.b32.xlu0 %v386_v38, %s1322_s28  ;;  %v411_v40 = vadd.f32 %v410_v39, %v409_v36  ;;  %1196 = vmatpush3.msra.mxu0 %v477_v27 }
 0x13d   :  { %412 = vrot.lane.b32.xlu0 %v411_v40, %s1322_s28 }
 0x1ab   :  { %v388_v41 = vpop.permute.xlu0 %387 }
 0x1ac   :  { %v389_v43 = vadd.f32 %v388_v41, %v386_v38 }
 0x1ae   :  { %390 = vrot.lane.b32.xlu1 %v389_v43, %s1324_s0 }
 0x1af   :  { %v413_v44 = vpop.permute.xlu0 %412 }
 0x1b0   :  { %v414_v45 = vadd.f32 %v413_v44, %v411_v40  ;;  %v434_v40 = vlaneseq }
 0x1b2   :  { %415 = vrot.lane.b32.xlu1 %v414_v45, %s1324_s0  ;;  %v435_v41 = vshrl.u32 %v434_v40, 7 }
 0x1b4   :  { %v1468_v44 = vsub.s32 0, %v435_v41 }
 0x220   :  { %v391_v46 = vpop.permute.xlu1 %390 }
 0x221   :  { %v392_v47 = vadd.f32 %v391_v46, %v389_v43  ;;  %v376_v43 = vld [vmem:[%s1520_s3] sm:$0x1] }
 0x223   :  { %393 = vrot.lane.b32.xlu0 %v392_v47, %s1325_s2 }
 0x224   :  { %v416_v48 = vpop.permute.xlu1 %415 }
 0x225   :  { %v417_v49 = vadd.f32 %v416_v48, %v414_v45 }
 0x227   :  { %418 = vrot.lane.b32.xlu1 %v417_v49, %s1325_s2 }
 0x295   :  { %v394_v52 = vpop.permute.xlu0 %393 }
 0x296   :  { %v1455_v54 = vadd.f32 %v394_v52, %v392_v47  ;;  %v377_v47 = vld [vmem:[%s1521_s4] sm:$0x1] }
 0x298   :  { %396 = vrot.lane.b32.xlu0 %v1455_v54, %s1326_s13 }
 0x299   :  { %v419_v56 = vpop.permute.xlu1 %418 }
 0x29a   :  { %v1459_v58 = vadd.f32 %v419_v56, %v417_v49 }
 0x29c   :  { %421 = vrot.lane.b32.xlu1 %v1459_v58, %s1326_s13 }
 0x30a   :  { %v397_v28 = vpop.permute.xlu0 %396 }
 0x30b   :  { %v398_v29 = vadd.f32 %v397_v28, %v1455_v54 }
 0x30d   :  { %v424_v30 = vmul.f32 0.001953125, %v398_v29 }
 0x30e   :  { %v422_v31 = vpop.permute.xlu1 %421 }
 0x30f   :  { %v423_v33 = vadd.f32 %v422_v31, %v1459_v58  ;;  %v426_v35 = vmul.f32 %v424_v30, %v424_v30 }
 0x311   :  { %v425_v36 = vmul.f32 0.001953125, %v423_v33 }
 0x313   :  { %v427_v38 = vsub.f32 %v425_v36, %v426_v35 }
 0x315   :  { %v428_v39 = vadd.f32 1e-05, %v427_v38 }
 0x317   :  { %1250 = vrsqrt.f32 %v428_v39 }
 0x324   :  { %v1251_v45 = vpop.eup %1250 }
 0x325   :  { %v430_v46 = vmul.f32 %v1251_v45, %v376_v43 }
 0x327   :  { %v431_v48 = vmul.f32 %v430_v46, %v424_v30  ;;  %v437_v49 = vrot.slane %v430_v46, %v1468_v44 }
 0x329   :  { %v432_v50 = vsub.f32 %v377_v47, %v431_v48  ;;  %v439_v51 = vmul.f32 %v437_v49, %v1431_v9  ;;  %v440_v52 = vmul.f32 %v437_v49, %v1429_v8  ;;  %v441_v53 = vmul.f32 %v437_v49, %v1441_v18  ;;  %v695_v8 = vld [vmem:[#allocation6 + $0x170] sm:$0xff]  ;;  %v694_v9 = vld [vmem:[#allocation6 + $0x168] sm:$0xff] }
 0x32a   :  { %v442_v54 = vmul.f32 %v437_v49, %v1439_v17  ;;  %v693_v17 = vld [vmem:[#allocation6 + $0x160] sm:$0xff] }
 0x32b   :  { %v447_v55 = vrot.slane %v432_v50, %v1468_v44 }
 0x32d   :  { %v449_v56 = vadd.f32 %v447_v55, %v439_v51  ;;  %v450_v57 = vadd.f32 %v447_v55, %v440_v52  ;;  %v451_v58 = vadd.f32 %v447_v55, %v441_v53  ;;  %v452_v59 = vadd.f32 %v447_v55, %v442_v54 }
 0x32f   :  { %v453_v60 = vmax.f32 %v449_v56, 0.0  ;;  %v454_v61 = vmax.f32 %v450_v57, 0.0  ;;  %v455_v62 = vmax.f32 %v451_v58, 0.0  ;;  %v456_v63 = vmax.f32 %v452_v59, 0.0 }
 0x331   :  { %457 = vst [vmem:[#allocation2 + $0x1] sm:$0xff] %v453_v60  ;;  %458 = vst [vmem:[#allocation2 + $0x9] sm:$0xff] %v454_v61  ;;  %1159 = vmatprep.mubr.f32.mxu1 %v453_v60 }
 0x332   :  { %459 = vst [vmem:[#allocation2 + $0x19] sm:$0xff] %v455_v62  ;;  %460 = vst [vmem:[#allocation2 + $0x21] sm:$0xff] %v456_v63  ;;  %1160 = vmatmul.mubr.f32.vlgmr.msra.gmra.mxu1 %v454_v61 }
 0x333   :  { %1204 = vmatpush3.msra.mxu1 %v696_v25  ;;  %1162 = vmatprep.mubr.f32.mxu1 %v455_v62 }
 0x334   :  { %1205 = vmatprep.subr.mxu1 %v695_v8 }
 0x335   :  { %1206 = vmatpush3.msra.mxu1 %v695_v8 }
 0x336   :  { %1207 = vmatprep.subr.mxu1 %v694_v9  ;;  %1163 = vmatmul.mubr.f32.gmra.mxu1 %v456_v63 }
 0x337   :  { %1208 = vmatpush3.msra.mxu1 %v694_v9 }
 0x338   :  { %v465_v18 = vld [vmem:[#allocation2] sm:$0xff]  ;;  %v466_v0 = vld [vmem:[#allocation2 + $0x8] sm:$0xff]  ;;  %1209 = vmatprep.subr.mxu1 %v693_v17 }
 0x339   :  { %1197 = vmatprep.mubr.f32.mxu0 %v465_v18  ;;  %v473_v2 = vld [vmem:[#allocation2 + $0x2] sm:$0xff]  ;;  %1210 = vmatpush3.msra.mxu1 %v693_v17  ;;  %v467_v3 = vld [vmem:[#allocation2 + $0x18] sm:$0xff]  ;;  %v474_v20 = vld [vmem:[#allocation2 + $0xa] sm:$0xff] }
 0x33a   :  { %1198 = vmatmul.mubr.f32.vlgmr.msra.gmra.mxu0 %v466_v0  ;;  %1235 = vmatprep.mubr.f32.mxu1 %v473_v2  ;;  %v468_v6 = vld [vmem:[#allocation2 + $0x20] sm:$0xff] }
 0x33b   :  { %1200 = vmatprep.mubr.f32.mxu0 %v467_v3  ;;  %1211 = vmatprep.subr.mxu1 %v692_v1  ;;  %v475_v21 = vld [vmem:[#allocation2 + $0x1a] sm:$0xff]  ;;  %v476_v22 = vld [vmem:[#allocation2 + $0x22] sm:$0xff] }
 0x33c   :  { %1212 = vmatpush3.msra.mxu1 %v692_v1 }
 0x33d   :  { %1213 = vmatprep.subr.mxu1 %v691_v4 }
 0x33e   :  { %1201 = vmatmul.mubr.f32.gmra.mxu0 %v468_v6  ;;  %1214 = vmatpush3.msra.mxu1 %v691_v4 }
 0x33f   :  { %1215 = vmatprep.subr.mxu1 %v690_v5 }
 0x340   :  { %1216 = vmatpush3.msra.mxu1 %v690_v5 }
 0x341   :  { %1217 = vmatprep.subr.mxu1 %v689_v7 }
 0x342   :  { %1218 = vmatpush3.msra.mxu1 %v689_v7 }
 0x343   :  { %1219 = vmatprep.subr.mxu1 %v688_v10 }
 0x344   :  { %1220 = vmatpush3.msra.mxu1 %v688_v10 }
 0x345   :  { %1221 = vmatprep.subr.mxu1 %v687_v11 }
 0x346   :  { %1222 = vmatpush3.msra.mxu1 %v687_v11 }
 0x347   :  { %1223 = vmatprep.subr.mxu1 %v686_v12 }
 0x348   :  { %1224 = vmatpush3.msra.mxu1 %v686_v12 }
 0x349   :  { %1225 = vmatprep.subr.mxu1 %v685_v13 }
 0x34a   :  { %1226 = vmatpush3.msra.mxu1 %v685_v13 }
 0x34b   :  { %1227 = vmatprep.subr.mxu1 %v684_v14 }
 0x34c   :  { %1228 = vmatpush3.msra.mxu1 %v684_v14 }
 0x34d   :  { %1229 = vmatprep.subr.mxu1 %v683_v15 }
 0x34e   :  { %1230 = vmatpush3.msra.mxu1 %v683_v15 }
 0x34f   :  { %1231 = vmatprep.subr.mxu1 %v682_v16 }
 0x350   :  { %1232 = vmatpush3.msra.mxu1 %v682_v16 }
 0x351   :  { %1233 = vmatprep.subr.mxu1 %v681_v19 }
 0x352   :  { %1234 = vmatpush3.msra.mxu1 %v681_v19 }
 0x353   :  { %1236 = vmatmul.mubr.f32.vlgmr.msra.gmra.mxu1 %v474_v20 }
 0x354   :  { %1238 = vmatprep.mubr.f32.mxu1 %v475_v21 }
 0x357   :  { %1239 = vmatmul.mubr.f32.gmra.mxu1 %v476_v22 }
 0x3f2   :  { %v1161_v23 = vpop.f32.mrf.mxu1 }
 0x3f4   :  { %v576_v25 = vpop.f32.mrf.mxu1 }
 0x3f6   :  { %v1164_v27 = vpop.f32.mrf.mxu1 }
 0x3f8   :  { %v586_v29 = vpop.f32.mrf.mxu1 }
 0x3fa   :  { %v1199_v24 = vpop.f32.mrf.mxu0 }
 0x3fb   :  { %v667_v31 = vadd.f32 %v1199_v24, %v1161_v23 }
 0x3fc   :  { %v661_v26 = vpop.f32.mrf.mxu0 }
 0x3fd   :  { %v662_v33 = vadd.f32 %v661_v26, %v576_v25 }
 0x3fe   :  { %v1202_v28 = vpop.f32.mrf.mxu0 }
 0x3ff   :  { %v677_v41 = vadd.f32 %v1202_v28, %v1164_v27  ;;  %v786_v27 = vld [vmem:[%s1522_s5] sm:$0x1]  ;;  %s1328_s5 = smov [#allocation8]  }
 0x400   :  { %v671_v35 = vpop.f32.mrf.mxu0  ;;  %s880_s20 = sshll.u32 %s1328_s5, 4  ;;  %s881_s20 = int_to_ptr.vmem [resolvable:$true] %s880_s20 }
 0x401   :  { %v672_v43 = vadd.f32 %v671_v35, %v586_v29  ;;  %p1299_p11 = scmp.lt.s32.totalorder %s881_s20, %s881_s20 }
 0x413   :  { %v1237_v30 = vpop.f32.mrf.mxu1 }
 0x414   :  { %v1479_v38 = vadd.f32 %v1237_v30, %v667_v31  ;;  %v787_v30 = vld [vmem:[%s1523_s6] sm:$0x1]  ;;  %s1294_s6 = scalar_lea.vmem %s881_s20, 512 }
 0x415   :  { %v763_v36 = vpop.f32.mrf.mxu1  ;;  %p1295_p10 = scmp.ne.s32.totalorder %s881_s20, %s1294_s6  ;;  %p1300_p12 = scmp.lt.s32.totalorder %s1294_s6, %s1294_s6 }
 0x416   :  { %v1481_v39 = vadd.f32 %v763_v36, %v662_v33  ;;  %v810_v47 = vmul.f32 %v1479_v38, %v1479_v38 }
 0x417   :  { %v1240_v40 = vpop.f32.mrf.mxu1  ;;  %p1301_p13 = por %p1300_p12, %p1299_p11 }
 0x418   :  { %v809_v45 = vmul.f32 %v1481_v39, %v1481_v39  ;;  %v788_v48 = vadd.f32 %v1479_v38, %v1481_v39  ;;  %v785_v49 = vadd.f32 %v1240_v40, %v677_v41 }
 0x419   :  { %v773_v46 = vpop.f32.mrf.mxu1  ;;  %p1302_p0 = pnand %p1301_p13, %p1295_p10 }
 0x41a   :  { %v784_v50 = vadd.f32 %v773_v46, %v672_v43  ;;  %v813_v51 = vadd.f32 %v810_v47, %v809_v45  ;;  %v812_v54 = vmul.f32 %v785_v49, %v785_v49 }
 0x41c   :  { %v789_v52 = vadd.f32 %v788_v48, %v784_v50  ;;  %v811_v53 = vmul.f32 %v784_v50, %v784_v50 }
 0x41e   :  { %v790_v55 = vadd.f32 %v789_v52, %v785_v49  ;;  %v814_v56 = vadd.f32 %v813_v51, %v811_v53 }
 0x420   :  { %v791_v57 = vrot.slane %v790_v55, 4  ;;  %v815_v58 = vadd.f32 %v814_v56, %v812_v54 }
 0x422   :  { %v792_v59 = vadd.f32 %v791_v57, %v790_v55  ;;  %v816_v60 = vrot.slane %v815_v58, 4 }
 0x424   :  { %v793_v61 = vrot.slane %v792_v59, 2  ;;  %v817_v62 = vadd.f32 %v816_v60, %v815_v58 }
 0x426   :  { %v794_v63 = vadd.f32 %v793_v61, %v792_v59  ;;  %v818_v8 = vrot.slane %v817_v62, 2 }
 0x428   :  { %v795_v9 = vrot.slane %v794_v63, 1  ;;  %v819_v17 = vadd.f32 %v818_v8, %v817_v62 }
 0x42a   :  { %v796_v18 = vadd.f32 %v795_v9, %v794_v63  ;;  %v820_v0 = vrot.slane %v819_v17, 1 }
 0x42c   :  { %797 = vrot.lane.b32.xlu0 %v796_v18, %s1322_s28  ;;  %v821_v1 = vadd.f32 %v820_v0, %v819_v17 }
 0x42e   :  { %822 = vrot.lane.b32.xlu1 %v821_v1, %s1322_s28 }
 0x49e   :  { %v798_v2 = vpop.permute.xlu0 %797 }
 0x49f   :  { %v799_v3 = vadd.f32 %v798_v2, %v796_v18 }
 0x4a0   :  { %v823_v4 = vpop.permute.xlu1 %822 }
 0x4a1   :  { %v824_v5 = vadd.f32 %v823_v4, %v821_v1  ;;  %800 = vrot.lane.b32.xlu0 %v799_v3, %s1324_s0 }
 0x4a3   :  { %825 = vrot.lane.b32.xlu1 %v824_v5, %s1324_s0 }
 0x513   :  { %v801_v6 = vpop.permute.xlu0 %800 }
 0x514   :  { %v802_v7 = vadd.f32 %v801_v6, %v799_v3 }
 0x515   :  { %v826_v10 = vpop.permute.xlu1 %825 }
 0x516   :  { %v827_v11 = vadd.f32 %v826_v10, %v824_v5  ;;  %803 = vrot.lane.b32.xlu0 %v802_v7, %s1325_s2 }
 0x518   :  { %828 = vrot.lane.b32.xlu1 %v827_v11, %s1325_s2 }
 0x588   :  { %v804_v12 = vpop.permute.xlu0 %803 }
 0x589   :  { %v805_v13 = vadd.f32 %v804_v12, %v802_v7 }
 0x58a   :  { %v829_v14 = vpop.permute.xlu1 %828 }
 0x58b   :  { %v830_v15 = vadd.f32 %v829_v14, %v827_v11  ;;  %806 = vrot.lane.b32.xlu0 %v805_v13, %s1326_s13 }
 0x58d   :  { %831 = vrot.lane.b32.xlu1 %v830_v15, %s1326_s13 }
 0x5fd   :  { %v807_v16 = vpop.permute.xlu0 %806 }
 0x5fe   :  { %v808_v19 = vadd.f32 %v807_v16, %v805_v13 }
 0x5ff   :  { %v832_v20 = vpop.permute.xlu1 %831 }
 0x600   :  { %v834_v21 = vmul.f32 0.001953125, %v808_v19  ;;  %v833_v22 = vadd.f32 %v832_v20, %v830_v15 }
 0x602   :  { %v836_v23 = vmul.f32 %v834_v21, %v834_v21  ;;  %v835_v24 = vmul.f32 0.001953125, %v833_v22 }
 0x604   :  { %v837_v25 = vsub.f32 %v835_v24, %v836_v23 }
 0x606   :  { %v838_v26 = vadd.f32 1e-05, %v837_v25 }
 0x608   :  { %1252 = vrsqrt.f32 %v838_v26 }
 0x615   :  { %v1253_v28 = vpop.eup %1252 }
 0x616   :  { %v840_v29 = vmul.f32 %v1253_v28, %v786_v27 }
 0x618   :  { %v841_v31 = vmul.f32 %v840_v29, %v834_v21  ;;  %v847_v33 = vrot.slane %v840_v29, %v1468_v44 }
 0x61a   :  { %v842_v35 = vsub.f32 %v787_v30, %v841_v31  ;;  %v849_v36 = vmul.f32 %v847_v33, %v1481_v39  ;;  %v850_v40 = vmul.f32 %v847_v33, %v1479_v38  ;;  %v851_v41 = vmul.f32 %v847_v33, %v784_v50 }
 0x61b   :  { %v852_v43 = vmul.f32 %v847_v33, %v785_v49 }
 0x61c   :  { %v857_v45 = vrot.slane %v842_v35, %v1468_v44 }
 0x61e   :  { %v859_v46 = vadd.f32 %v857_v45, %v849_v36  ;;  %v860_v47 = vadd.f32 %v857_v45, %v850_v40  ;;  %v861_v48 = vadd.f32 %v857_v45, %v851_v41  ;;  %v862_v51 = vadd.f32 %v857_v45, %v852_v43 }
 0x620   :  { %v863_v52 = vadd.f32 %v859_v46, %v1384_v32  ;;  %v864_v53 = vadd.f32 %v860_v47, %v1392_v34  ;;  %v865_v54 = vadd.f32 %v861_v48, %v1401_v37  ;;  %v866_v39 = vadd.f32 %v862_v51, %v1414_v42 }
 0x622   :  { %v867_v55 = vmax.f32 %v863_v52, 0.0  ;;  %v868_v38 = vmax.f32 %v864_v53, 0.0  ;;  %v869_v50 = vmax.f32 %v865_v54, 0.0  ;;  %v870_v49 = vmax.f32 %v866_v39, 0.0 }
 0x624   :  { %871 = vst [vmem:[#allocation8] sm:$0xff] %v867_v55  ;;  %872 = vst [vmem:[#allocation8 + $0x8] sm:$0xff] %v868_v38 }
 0x625   :  { %873 = vst [vmem:[#allocation8 + $0x10] sm:$0xff] %v869_v50  ;;  %874 = vst [vmem:[#allocation8 + $0x18] sm:$0xff] %v870_v49 }
 0x626   :  { %1305 = shalt.err (!%p1302_p0)
}
 0x627   :  { %886 = dma.vmem_to_hbm [thread:$0]  %s881_s20, 512, %s1524_s7, [#allocation5], %s1321_s27, %s1321_s27, %s1322_s28  }
 0x628   :  { %1318 = dma.done.wait [#allocation5], 512  }
 0x629   :  { %1319 = vsyncadd [#allocation5], 4294966784 }
 0x62a   :  { %890 = vsyncpa [#allocation4], 1 }
 0x62b   :  { %891 = vsyncpa [#allocation7], 1 }
 0x62c   :  { %892 = vsyncpa [#allocation5], 1 }

</bundles_post_ra>
